<compile_context>
chip_gen: v7x
topology: tpu7x:2x2x1
jax: 0.10.0
libtpu: 0.0.40
codegen_flags: <defaults>
</compile_context>

<pallas_src>
import functools

import jax
import jax.numpy as jnp
from jax.experimental import pallas as pl
from jax.experimental.pallas import tpu as pltpu

_LANE = 128
_VMEM_LIMIT = 48 * 1024 * 1024        # <= v7x physical 64 MiB, plenty on v5e/v6e
_SINGLE_K_BUDGET = 24 * 1024 * 1024   # if K/V fit here, use a single key step


def _round_up(x, m):
    return (x + m - 1) // m * m


def _padded_len(n):
    """Lane-aligned padded N.  Large N is padded to a 512 quantum so 512-wide
    q/k tiles always divide it (padded key columns are masked in-kernel)."""
    if n >= 1024:
        return _round_up(n, 512)
    return _round_up(n, _LANE)


def _pick_tile(n_pad, requested):
    """Largest power-of-two multiple of 128 <= requested that divides n_pad."""
    t = _LANE
    limit = max(_LANE, min(requested, n_pad))
    while t * 2 <= limit and n_pad % (t * 2) == 0:
        t *= 2
    return t


def _single_step_fits(c, cq, tq, n_pad):
    """Double-buffered VMEM estimate for the attention call with tk = n_pad."""
    per_step = (cq * tq * 2       # q tile (bf16)
                + n_pad * cq * 2  # full K^T (bf16)
                + c * n_pad * 2   # full V (bf16)
                + c * tq * 4      # residual x tile (fp32)
                + c * tq * 4)     # output tile (fp32, accumulator)
    return 2 * per_step + 2 * tq * 4 <= _SINGLE_K_BUDGET


def _bf16_eup_available():
    """bf16 EUP/VPU exists on v6e and newer; keep fp32 exp on v5e and older."""
    try:
        kind = jax.devices()[0].device_kind.lower()
    except Exception:
        return False
    return not any(tag in kind for tag in ("v2", "v3", "v4", "v5"))


# -----------------------------------------------------------------------------
# Kernel 1: fused 1x1-conv projection  x -> q, k, v   (three separate outputs)
# -----------------------------------------------------------------------------
def _qkv_projection_kernel(wq_ref, wk_ref, wv_ref, bq_ref, bk_ref, bv_ref,
                           x_ref, q_ref, k_ref, v_ref):
    # weights: bf16, resident.  biases: fp32 columns, resident.
    # x_ref: (1, C, tn) fp32 tile.  outputs: (1, Cq/Cq/C, tn) bf16 tiles.
    xt = x_ref[0].astype(jnp.bfloat16)                                     # (C, tn)
    q = jnp.dot(wq_ref[...], xt, preferred_element_type=jnp.float32) + bq_ref[...]
    k = jnp.dot(wk_ref[...], xt, preferred_element_type=jnp.float32) + bk_ref[...]
    v = jnp.dot(wv_ref[...], xt, preferred_element_type=jnp.float32) + bv_ref[...]
    q_ref[0] = q.astype(jnp.bfloat16)
    k_ref[0] = k.astype(jnp.bfloat16)
    v_ref[0] = v.astype(jnp.bfloat16)


# -----------------------------------------------------------------------------
# Kernel 2: position attention with online softmax (flash-attention style)
# -----------------------------------------------------------------------------
def _pam_attention_kernel(gamma_ref, n_ref, q_ref, kt_ref, v_ref, x_ref, o_ref,
                          m_ref, l_ref, *, mask_keys, bf16_exp):
    # gamma_ref/n_ref: SMEM scalar prefetch (gamma, real N).
    # q_ref: (1, Cq, tq) bf16   kt_ref: (1, tk, Cq) bf16   v_ref: (1, C, tk) bf16
    # x_ref: (1, C, tq) fp32 residual   o_ref: (1, C, tq) fp32 (accumulator,
    # resident over the ki axis)   scratch: m, l (1, tq) fp32.
    ki = pl.program_id(2)

    @pl.when(ki == 0)
    def _init():
        m_ref[...] = jnp.full(m_ref.shape, -jnp.inf, dtype=m_ref.dtype)
        l_ref[...] = jnp.zeros(l_ref.shape, dtype=l_ref.dtype)
        o_ref[...] = jnp.zeros(o_ref.shape, dtype=o_ref.dtype)

    q = q_ref[0]      # (Cq, tq)
    kt = kt_ref[0]    # (tk, Cq)
    v = v_ref[0]      # (C, tk)

    # s_t[j, i] = energy[i, j] for this (q-tile, k-tile) pair; bf16 MXU, fp32 acc.
    s_t = jnp.dot(kt, q, preferred_element_type=jnp.float32)              # (tk, tq)

    if mask_keys:
        tk = s_t.shape[0]
        key_pos = ki * tk + jax.lax.broadcasted_iota(jnp.int32, s_t.shape, 0)
        s_t = jnp.where(key_pos < n_ref[0], s_t, -1e30)                   # pad keys out

    # Online softmax over the key axis; bookkeeping stays fp32 on all chips.
    m_prev = m_ref[...]                                                   # (1, tq)
    m_new = jnp.maximum(m_prev, jnp.max(s_t, axis=0, keepdims=True))
    alpha = jnp.exp(m_prev - m_new)                                       # (1, tq)
    if bf16_exp:
        # bf16 exp (EUP) on v6e/v7x; p feeds the PV matmul directly.
        p = jnp.exp((s_t - m_new).astype(jnp.bfloat16))                   # (tk, tq)
        p_sum = jnp.sum(p, axis=0, keepdims=True, dtype=jnp.float32)
    else:
        p32 = jnp.exp(s_t - m_new)                                        # fp32 (v5e)
        p = p32.astype(v.dtype)
        p_sum = jnp.sum(p32, axis=0, keepdims=True)
    l_ref[...] = alpha * l_ref[...] + p_sum
    m_ref[...] = m_new
    # Accumulate directly in the fp32 output block (no separate acc scratch).
    o_ref[0] = alpha * o_ref[0] + jnp.dot(v, p, preferred_element_type=jnp.float32)

    @pl.when(ki == pl.num_programs(2) - 1)
    def _finalize():
        inv_l = pl.reciprocal(l_ref[...], approx=True)                    # (1, tq)
        o_ref[0] = gamma_ref[0] * (o_ref[0] * inv_l) + x_ref[0].astype(jnp.float32)


# -----------------------------------------------------------------------------
# Module wrapper
# -----------------------------------------------------------------------------
def pam_module(x, params, *, tile_q=None, tile_k=None, tile_proj=None,
               bf16_softmax=None):
    """x: (B, C, H, W) float32. params: dict(wq, bq, wk, bk, wv, bv, gamma)."""
    B, C, H, W = x.shape
    N = H * W
    Cq = params["wq"].shape[0]

    N_pad = _padded_len(N)
    x_flat = x.reshape(B, C, N).astype(jnp.float32)
    if N_pad != N:
        x_flat = jnp.pad(x_flat, ((0, 0), (0, 0), (0, N_pad - N)))

    # Weight cast hoisted out of the kernel; biases stay fp32 (post-MXU add).
    wq = params["wq"].astype(jnp.bfloat16)
    wk = params["wk"].astype(jnp.bfloat16)
    wv = params["wv"].astype(jnp.bfloat16)
    bq = params["bq"].astype(jnp.float32).reshape(-1, 1)
    bk = params["bk"].astype(jnp.float32).reshape(-1, 1)
    bv = params["bv"].astype(jnp.float32).reshape(-1, 1)

    tn = _pick_tile(N_pad, tile_proj if tile_proj is not None else 512)
    q, k, v = pl.pallas_call(
        _qkv_projection_kernel,
        out_shape=(
            jax.ShapeDtypeStruct((B, Cq, N_pad), jnp.bfloat16),
            jax.ShapeDtypeStruct((B, Cq, N_pad), jnp.bfloat16),
            jax.ShapeDtypeStruct((B, C, N_pad), jnp.bfloat16),
        ),
        grid_spec=pltpu.PrefetchScalarGridSpec(
            num_scalar_prefetch=0,
            grid=(B, N_pad // tn),
            in_specs=[
                pl.BlockSpec((Cq, C), lambda b, n: (0, 0)),   # weights resident
                pl.BlockSpec((Cq, C), lambda b, n: (0, 0)),
                pl.BlockSpec((C, C), lambda b, n: (0, 0)),
                pl.BlockSpec((Cq, 1), lambda b, n: (0, 0)),   # biases resident
                pl.BlockSpec((Cq, 1), lambda b, n: (0, 0)),
                pl.BlockSpec((C, 1), lambda b, n: (0, 0)),
                pl.BlockSpec((1, C, tn), lambda b, n: (b, 0, n)),
            ],
            out_specs=[
                pl.BlockSpec((1, Cq, tn), lambda b, n: (b, 0, n)),
                pl.BlockSpec((1, Cq, tn), lambda b, n: (b, 0, n)),
                pl.BlockSpec((1, C, tn), lambda b, n: (b, 0, n)),
            ],
        ),
        compiler_params=pltpu.CompilerParams(
            dimension_semantics=("parallel", "parallel"),
            vmem_limit_bytes=_VMEM_LIMIT,
        ),
    )(wq, wk, wv, bq, bk, bv, x_flat)

    # Only K (Cq x N bf16, the smallest tensor) takes an extra XLA copy for the
    # transpose; the big qkv slice/copy passes of the previous version are gone.
    # TODO(synk): fuse K^T into kernel 1 once small-sublane (Cq<8) in-kernel
    # transposes are guaranteed by Mosaic.
    kt = jnp.swapaxes(k, 1, 2)                                # (B, N_pad, Cq) bf16

    tq = _pick_tile(N_pad, tile_q if tile_q is not None else 512)
    if tile_k is None:
        # Single key step when full K/V fit VMEM: no per-step alpha rescale,
        # no V re-streaming.
        tk = N_pad if _single_step_fits(C, Cq, tq, N_pad) else _pick_tile(N_pad, 512)
    else:
        tk = _pick_tile(N_pad, tile_k)

    use_bf16_exp = _bf16_eup_available() if bf16_softmax is None else bool(bf16_softmax)
    kernel = functools.partial(_pam_attention_kernel,
                               mask_keys=(N_pad != N),
                               bf16_exp=use_bf16_exp)

    gamma = jnp.reshape(jnp.asarray(params["gamma"], jnp.float32), (1,))
    n_real = jnp.array([N], dtype=jnp.int32)

    out_flat = pl.pallas_call(
        kernel,
        out_shape=jax.ShapeDtypeStruct((B, C, N_pad), jnp.float32),
        grid_spec=pltpu.PrefetchScalarGridSpec(
            num_scalar_prefetch=2,                            # gamma, N -> SMEM
            grid=(B, N_pad // tq, N_pad // tk),
            in_specs=[
                pl.BlockSpec((1, Cq, tq), lambda b, qi, ki, g, n: (b, 0, qi)),
                pl.BlockSpec((1, tk, Cq), lambda b, qi, ki, g, n: (b, ki, 0)),
                pl.BlockSpec((1, C, tk), lambda b, qi, ki, g, n: (b, 0, ki)),
                pl.BlockSpec((1, C, tq), lambda b, qi, ki, g, n: (b, 0, qi)),
            ],
            out_specs=pl.BlockSpec((1, C, tq), lambda b, qi, ki, g, n: (b, 0, qi)),
            scratch_shapes=[
                pltpu.VMEM((1, tq), jnp.float32),             # running row max
                pltpu.VMEM((1, tq), jnp.float32),             # running denominator
            ],
        ),
        compiler_params=pltpu.CompilerParams(
            dimension_semantics=("parallel", "parallel", "arbitrary"),
            vmem_limit_bytes=_VMEM_LIMIT,
        ),
    )(gamma, n_real, q, kt, v, x_flat)

    if N_pad != N:
        out_flat = out_flat[:, :, :N]
    return out_flat.astype(x.dtype).reshape(B, C, H, W)


# -----------------------------------------------------------------------------
# Plain-JAX reference (mirrors the PyTorch forward, fp32)
# -----------------------------------------------------------------------------
def pam_reference(x, params):
    B, C, H, W = x.shape
    N = H * W
    xf = x.reshape(B, C, N).astype(jnp.float32)
    q = jnp.einsum("oc,bcn->bon", params["wq"], xf) + params["bq"][None, :, None]
    k = jnp.einsum("oc,bcn->bon", params["wk"], xf) + params["bk"][None, :, None]
    v = jnp.einsum("oc,bcn->bon", params["wv"], xf) + params["bv"][None, :, None]
    energy = jnp.einsum("bci,bcj->bij", q, k)
    attention = jax.nn.softmax(energy, axis=-1)
    out = jnp.einsum("bij,bcj->bci", attention, v)
    out = params["gamma"].reshape(())[...] * out + xf
    return out.reshape(B, C, H, W)


if __name__ == "__main__":
    key = jax.random.PRNGKey(0)
    B, C, H, W = 2, 16, 16, 16           # N = 256, Cq = C // 8 = 2
    Cq = C // 8
    kx, kwq, kbq, kwk, kbk, kwv, kbv, kx2 = jax.random.split(key, 8)

    x = jax.random.normal(kx, (B, C, H, W), dtype=jnp.float32)

    bound = 1.0 / (C ** 0.5)             # PyTorch Conv2d default init range
    params = {
        "wq": jax.random.uniform(kwq, (Cq, C), jnp.float32, -bound, bound),
        "bq": jax.random.uniform(kbq, (Cq,), jnp.float32, -bound, bound),
        "wk": jax.random.uniform(kwk, (Cq, C), jnp.float32, -bound, bound),
        "bk": jax.random.uniform(kbk, (Cq,), jnp.float32, -bound, bound),
        "wv": jax.random.uniform(kwv, (C, C), jnp.float32, -bound, bound),
        "bv": jax.random.uniform(kbv, (C,), jnp.float32, -bound, bound),
        "gamma": jnp.zeros((1,), dtype=jnp.float32),   # PAM_Module init
    }

    # 1) gamma = 0 (module init): output must equal the input (residual only).
    out0 = jax.block_until_ready(
        pam_module(x, params, tile_q=128, tile_k=128, tile_proj=128))
    assert out0.shape == (B, C, H, W)
    assert jnp.allclose(out0, x, atol=1e-6, rtol=0.0)

    # 2) gamma = 0.5, small tiles -> exercises the multi-step online softmax.
    params2 = dict(params, gamma=jnp.array([0.5], dtype=jnp.float32))
    out_tiled = jax.block_until_ready(
        pam_module(x, params2, tile_q=128, tile_k=128, tile_proj=128))
    ref = pam_reference(x, params2)
    assert jnp.allclose(out_tiled, ref, atol=2e-2, rtol=2e-2)

    # 3) gamma = 0.5, auto tiling (single key step, K/V resident).
    out_auto = jax.block_until_ready(pam_module(x, params2))
    assert jnp.allclose(out_auto, ref, atol=2e-2, rtol=2e-2)

    # 4) Ragged spatial size: N = 100 -> padded to 128, padded keys masked.
    xr = jax.random.normal(kx2, (1, C, 10, 10), dtype=jnp.float32)
    out_r = jax.block_until_ready(pam_module(xr, params2))
    ref_r = pam_reference(xr, params2)
    assert jnp.allclose(out_r, ref_r, atol=2e-2, rtol=2e-2)

    print("KERNEL_OK")
</pallas_src>

<mosaic_0001>
module attributes {stable_mosaic.version = 11 : i64} {
  func.func @_qkv_projection_kernel(%arg0: i32, %arg1: i32, %arg2: memref<2x16xbf16, #tpu.memory_space<vmem>>, %arg3: memref<2x16xbf16, #tpu.memory_space<vmem>>, %arg4: memref<16x16xbf16, #tpu.memory_space<vmem>>, %arg5: memref<2x1xf32, #tpu.memory_space<vmem>>, %arg6: memref<2x1xf32, #tpu.memory_space<vmem>>, %arg7: memref<16x1xf32, #tpu.memory_space<vmem>>, %arg8: memref<1x16x128xf32, #tpu.memory_space<vmem>>, %arg9: memref<1x2x128xbf16, #tpu.memory_space<vmem>>, %arg10: memref<1x2x128xbf16, #tpu.memory_space<vmem>>, %arg11: memref<1x16x128xbf16, #tpu.memory_space<vmem>>) attributes {dimension_semantics = [#tpu.dimension_semantics<parallel>, #tpu.dimension_semantics<parallel>], iteration_bounds = array<i64: 2, 2>, scalar_prefetch = 0 : i64, scratch_operands = 0 : i64, tpu.core_type = #tpu.core_type<tc>, window_params = [{pipeline_mode = #tpu.pipeline_mode<synchronous>, transform_indices = @transform_0, window_bounds = array<i64: 2, 16>}, {pipeline_mode = #tpu.pipeline_mode<synchronous>, transform_indices = @transform_1, window_bounds = array<i64: 2, 16>}, {pipeline_mode = #tpu.pipeline_mode<synchronous>, transform_indices = @transform_2, window_bounds = array<i64: 16, 16>}, {pipeline_mode = #tpu.pipeline_mode<synchronous>, transform_indices = @transform_3, window_bounds = array<i64: 2, 1>}, {pipeline_mode = #tpu.pipeline_mode<synchronous>, transform_indices = @transform_4, window_bounds = array<i64: 2, 1>}, {pipeline_mode = #tpu.pipeline_mode<synchronous>, transform_indices = @transform_5, window_bounds = array<i64: 16, 1>}, {transform_indices = @transform_6, window_bounds = array<i64: 1, 16, 128>}, {transform_indices = @transform_7, window_bounds = array<i64: 1, 2, 128>}, {transform_indices = @transform_8, window_bounds = array<i64: 1, 2, 128>}, {transform_indices = @transform_9, window_bounds = array<i64: 1, 16, 128>}]} {
    %c0 = arith.constant 0 : index
    %c0_0 = arith.constant 0 : index
    %c0_1 = arith.constant 0 : index
    %0 = vector.load %arg8[%c0, %c0_0, %c0_1] : memref<1x16x128xf32, #tpu.memory_space<vmem>>, vector<1x16x128xf32>
    %1 = vector.shape_cast %0 : vector<1x16x128xf32> to vector<16x128xf32>
    %2 = arith.truncf %1 : vector<16x128xf32> to vector<16x128xbf16>
    %c0_2 = arith.constant 0 : index
    %c0_3 = arith.constant 0 : index
    %3 = vector.load %arg2[%c0_2, %c0_3] : memref<2x16xbf16, #tpu.memory_space<vmem>>, vector<2x16xbf16>
    %cst = arith.constant dense<0.000000e+00> : vector<2x128xf32>
    %4 = tpu.matmul %3, %2, %cst {dimension_numbers = #tpu.dot_dimension_numbers<[1], [0], [0], [1], [0, 0, 1, 1], [], []>} : vector<2x16xbf16>, vector<16x128xbf16>, vector<2x128xf32> -> vector<2x128xf32>
    %c0_4 = arith.constant 0 : index
    %c0_5 = arith.constant 0 : index
    %5 = vector.load %arg5[%c0_4, %c0_5] : memref<2x1xf32, #tpu.memory_space<vmem>>, vector<2x1xf32>
    %6 = vector.broadcast %5 : vector<2x1xf32> to vector<2x128xf32>
    %7 = arith.addf %4, %6 : vector<2x128xf32>
    %c0_6 = arith.constant 0 : index
    %c0_7 = arith.constant 0 : index
    %8 = vector.load %arg3[%c0_6, %c0_7] : memref<2x16xbf16, #tpu.memory_space<vmem>>, vector<2x16xbf16>
    %cst_8 = arith.constant dense<0.000000e+00> : vector<2x128xf32>
    %9 = tpu.matmul %8, %2, %cst_8 {dimension_numbers = #tpu.dot_dimension_numbers<[1], [0], [0], [1], [0, 0, 1, 1], [], []>} : vector<2x16xbf16>, vector<16x128xbf16>, vector<2x128xf32> -> vector<2x128xf32>
    %c0_9 = arith.constant 0 : index
    %c0_10 = arith.constant 0 : index
    %10 = vector.load %arg6[%c0_9, %c0_10] : memref<2x1xf32, #tpu.memory_space<vmem>>, vector<2x1xf32>
    %11 = vector.broadcast %10 : vector<2x1xf32> to vector<2x128xf32>
    %12 = arith.addf %9, %11 : vector<2x128xf32>
    %c0_11 = arith.constant 0 : index
    %c0_12 = arith.constant 0 : index
    %13 = vector.load %arg4[%c0_11, %c0_12] : memref<16x16xbf16, #tpu.memory_space<vmem>>, vector<16x16xbf16>
    %cst_13 = arith.constant dense<0.000000e+00> : vector<16x128xf32>
    %14 = tpu.matmul %13, %2, %cst_13 {dimension_numbers = #tpu.dot_dimension_numbers<[1], [0], [0], [1], [0, 0, 1, 1], [], []>} : vector<16x16xbf16>, vector<16x128xbf16>, vector<16x128xf32> -> vector<16x128xf32>
    %c0_14 = arith.constant 0 : index
    %c0_15 = arith.constant 0 : index
    %15 = vector.load %arg7[%c0_14, %c0_15] : memref<16x1xf32, #tpu.memory_space<vmem>>, vector<16x1xf32>
    %16 = vector.broadcast %15 : vector<16x1xf32> to vector<16x128xf32>
    %17 = arith.addf %14, %16 : vector<16x128xf32>
    %18 = arith.truncf %7 : vector<2x128xf32> to vector<2x128xbf16>
    %c0_16 = arith.constant 0 : index
    %c0_17 = arith.constant 0 : index
    %c0_18 = arith.constant 0 : index
    %19 = vector.load %arg9[%c0_16, %c0_17, %c0_18] : memref<1x2x128xbf16, #tpu.memory_space<vmem>>, vector<1x2x128xbf16>
    %20 = vector.shape_cast %19 : vector<1x2x128xbf16> to vector<2x128xbf16>
    %21 = vector.shape_cast %18 : vector<2x128xbf16> to vector<1x2x128xbf16>
    tpu.vector_store %arg9[%c0_16, %c0_17, %c0_18], %21 {strides = array<i32>} : memref<1x2x128xbf16, #tpu.memory_space<vmem>>, vector<1x2x128xbf16>,
    %22 = arith.truncf %12 : vector<2x128xf32> to vector<2x128xbf16>
    %c0_19 = arith.constant 0 : index
    %c0_20 = arith.constant 0 : index
    %c0_21 = arith.constant 0 : index
    %23 = vector.load %arg10[%c0_19, %c0_20, %c0_21] : memref<1x2x128xbf16, #tpu.memory_space<vmem>>, vector<1x2x128xbf16>
    %24 = vector.shape_cast %23 : vector<1x2x128xbf16> to vector<2x128xbf16>
    %25 = vector.shape_cast %22 : vector<2x128xbf16> to vector<1x2x128xbf16>
    tpu.vector_store %arg10[%c0_19, %c0_20, %c0_21], %25 {strides = array<i32>} : memref<1x2x128xbf16, #tpu.memory_space<vmem>>, vector<1x2x128xbf16>,
    %26 = arith.truncf %17 : vector<16x128xf32> to vector<16x128xbf16>
    %c0_22 = arith.constant 0 : index
    %c0_23 = arith.constant 0 : index
    %c0_24 = arith.constant 0 : index
    %27 = vector.load %arg11[%c0_22, %c0_23, %c0_24] : memref<1x16x128xbf16, #tpu.memory_space<vmem>>, vector<1x16x128xbf16>
    %28 = vector.shape_cast %27 : vector<1x16x128xbf16> to vector<16x128xbf16>
    %29 = vector.shape_cast %26 : vector<16x128xbf16> to vector<1x16x128xbf16>
    tpu.vector_store %arg11[%c0_22, %c0_23, %c0_24], %29 {strides = array<i32>} : memref<1x16x128xbf16, #tpu.memory_space<vmem>>, vector<1x16x128xbf16>,
    return
  }
  func.func @transform_0(%arg0: i32, %arg1: i32) -> (i32, i32) {
    %c0_i32 = arith.constant 0 : i32
    %c0_i32_0 = arith.constant 0 : i32
    %c0_i32_1 = arith.constant 0 : i32
    return %c0_i32, %c0_i32_0 : i32, i32
  }
  func.func @transform_1(%arg0: i32, %arg1: i32) -> (i32, i32) {
    %c0_i32 = arith.constant 0 : i32
    %c0_i32_0 = arith.constant 0 : i32
    %c0_i32_1 = arith.constant 0 : i32
    return %c0_i32, %c0_i32_0 : i32, i32
  }
  func.func @transform_2(%arg0: i32, %arg1: i32) -> (i32, i32) {
    %c0_i32 = arith.constant 0 : i32
    %c0_i32_0 = arith.constant 0 : i32
    %c0_i32_1 = arith.constant 0 : i32
    return %c0_i32, %c0_i32_0 : i32, i32
  }
  func.func @transform_3(%arg0: i32, %arg1: i32) -> (i32, i32) {
    %c0_i32 = arith.constant 0 : i32
    %c0_i32_0 = arith.constant 0 : i32
    %c0_i32_1 = arith.constant 0 : i32
    return %c0_i32, %c0_i32_0 : i32, i32
  }
  func.func @transform_4(%arg0: i32, %arg1: i32) -> (i32, i32) {
    %c0_i32 = arith.constant 0 : i32
    %c0_i32_0 = arith.constant 0 : i32
    %c0_i32_1 = arith.constant 0 : i32
    return %c0_i32, %c0_i32_0 : i32, i32
  }
  func.func @transform_5(%arg0: i32, %arg1: i32) -> (i32, i32) {
    %c0_i32 = arith.constant 0 : i32
    %c0_i32_0 = arith.constant 0 : i32
    %c0_i32_1 = arith.constant 0 : i32
    return %c0_i32, %c0_i32_0 : i32, i32
  }
  func.func @transform_6(%arg0: i32, %arg1: i32) -> (i32, i32, i32) {
    %c0_i32 = arith.constant 0 : i32
    %c0_i32_0 = arith.constant 0 : i32
    return %arg0, %c0_i32, %arg1 : i32, i32, i32
  }
  func.func @transform_7(%arg0: i32, %arg1: i32) -> (i32, i32, i32) {
    %c0_i32 = arith.constant 0 : i32
    %c0_i32_0 = arith.constant 0 : i32
    return %arg0, %c0_i32, %arg1 : i32, i32, i32
  }
  func.func @transform_8(%arg0: i32, %arg1: i32) -> (i32, i32, i32) {
    %c0_i32 = arith.constant 0 : i32
    %c0_i32_0 = arith.constant 0 : i32
    return %arg0, %c0_i32, %arg1 : i32, i32, i32
  }
  func.func @transform_9(%arg0: i32, %arg1: i32) -> (i32, i32, i32) {
    %c0_i32 = arith.constant 0 : i32
    %c0_i32_0 = arith.constant 0 : i32
    return %arg0, %c0_i32, %arg1 : i32, i32, i32
  }
}

</mosaic_0001>

<bundles_post_ra>
// kernel: tpu_custom_call.1
= control target key start
LH: loop header
LB: loop body
LE: loop exit
PB: predicated region body
PF: predicated region fallthrough
CT: control target
= control target key end

     0   :  { %s1479_s0 = inlined_call_operand.vmem [shape: bf16[2,16], index: 0, kind: input, shape index: {}]   ;;  %s1480_s1 = inlined_call_operand.vmem [shape: bf16[2,16], index: 1, kind: input, shape index: {}]   ;;  %s1481_s2 = inlined_call_operand.vmem [shape: bf16[16,16], index: 2, kind: input, shape index: {}]   ;;  %s1482_s3 = inlined_call_operand.vmem [shape: f32[2,1], index: 3, kind: input, shape index: {}]   ;;  %s1483_s4 = inlined_call_operand.vmem [shape: f32[2,1], index: 4, kind: input, shape index: {}]   ;;  %s1484_s5 = inlined_call_operand.vmem [shape: f32[16,1], index: 5, kind: input, shape index: {}]   ;;  %s1485_s6 = inlined_call_operand.hbm [shape: f32[2,16,256], index: 6, kind: input, shape index: {}]   ;;  %s1486_s7 = inlined_call_operand.hbm [shape: bf16[2,2,256], index: 7, kind: output, shape index: {0}]   ;;  %s1487_s8 = inlined_call_operand.hbm [shape: bf16[2,2,256], index: 8, kind: output, shape index: {1}]   ;;  %s1488_s9 = inlined_call_operand.hbm [shape: bf16[2,16,256], index: 9, kind: output, shape index: {2}]  }
   0x1   :  { %1499 = sst [smem:[#allocation16_spill]] %s1479_s0 }
   0x2   :  { %1500 = sst [smem:[#allocation17_spill]] %s1480_s1 }
   0x3   :  { %1501 = sst [smem:[#allocation18_spill]] %s1481_s2 }
   0x4   :  { %1502 = sst [smem:[#allocation19_spill]] %s1482_s3 }
   0x5   :  { %1503 = sst [smem:[#allocation20_spill]] %s1483_s4 }
   0x6   :  { %1504 = sst [smem:[#allocation21_spill]] %s1486_s7 }
   0x7   :  { %1505 = sst [smem:[#allocation22_spill]] %s1487_s8 }
   0x8   :  { %1506 = sst [smem:[#allocation23_spill]] %s1488_s9 }
   0x9   :  { %15 = vsyncpa [#allocation3], 0 }
   0xa   :  { %17 = vsyncpa [#allocation3 + $0x1], 0 }
   0xb   :  { %18 = vsyncpa [#allocation4], 0 }
   0xc   :  { %20 = vsyncpa [#allocation4 + $0x1], 0 }
   0xd   :  { %21 = vsyncpa [#allocation7], 0 }
   0xe   :  { %23 = vsyncpa [#allocation7 + $0x1], 0  ;;  %s1177_s30 = smov 0   ;;  %s1179_s10 = smov 0  }
   0xf   :  { %s1181_s11 = smov 0   ;;  %s1183_s12 = smov 0  }
  0x10   :  { %s1185_s13 = smov 0   ;;  %s1187_s14 = smov 0  }
  0x11   :  { %s1189_s15 = smov 0   ;;  %s1191_s16 = smov 0  }
  0x12 LB: > { %1507 = sst [smem:[#allocation12_spill]] %s1084_s30  ;;  %s1218_s17 = sadd.s32 4294967295, %s1112_s16   ;;  %s1112_s16 = sphi %s1191_s16, %s29_s16   ;;  %s1108_s15 = sphi %s1189_s15, %s1538_s15   ;;  %s1104_s14 = sphi %s1187_s14, %s1537_s14   ;;  %s1100_s13 = sphi %s1185_s13, %s1536_s13   ;;  %s1096_s12 = sphi %s1183_s12, %s1535_s12   ;;  %s1092_s11 = sphi %s1181_s11, %s1534_s11   ;;  %s1088_s10 = sphi %s1179_s10, %s1533_s10   ;;  %s1084_s30 = sphi %s1177_s30, %s1532_s30  }
  0x13   : > { %s1497_s18 = sadd.s32 4294967294, %s1112_s16   ;;  %s38_s19 = sadd.s32 1, %s1104_s14 }
  0x14   : > { %s41_s20 = sadd.s32 1, %s1108_s15  ;;  %p39_p0 = scmp.ge.s32.totalorder %s38_s19, 2 }
  0x15   : > { %s176_s21 = sadd.s32 1, %s1092_s11  ;;  %p183_p1 = scmp.ne.s32.totalorder %s1092_s11, %s1088_s10 }
  0x16   : > { %p184_p2 = scmp.eq.s32.totalorder %s1112_s16, 0  ;;  %s1540_s19 = smov (%p39_p0, %s38_s19), 0 }
  0x17   : > { %1508 = sst [smem:[#allocation13_spill]] %s1540_s19  ;;  %s1542_s20 = smov (!%p39_p0, %s41_s20), %s1108_s15 }
  0x18   : > { %s172_s22 = ssub.s32 %s1104_s14, %s1540_s19  ;;  %p1232_p3 = por %p184_p2, %p183_p1 }
  0x19   : > { %p43_p4 = scmp.ge.s32.totalorder %s1542_s20, 2  ;;  %p189_p5 = scmp.ne.s32.totalorder %s1088_s10, %s1084_s30 }
  0x1a   : > { %p190_p6 = scmp.eq.s32.totalorder %s1218_s17, 0  ;;  %p215_p7 = scmp.eq.s32.totalorder %s1218_s17, 3 }
  0x1b   : > { %s1544_s20 = smov (%p43_p4, %s1542_s20), 0  ;;  %p221_p10 = scmp.eq.s32.totalorder %s1497_s18, 3 }
  0x1c   : > { %1510 = sst [smem:[#allocation14_spill]] %s1544_s20  ;;  %p1242_p8 = por %p190_p6, %p189_p5 }
  0x1d   : > { %p1246_p9 = por %p215_p7, %p183_p1  ;;  %s171_s26 = ssub.s32 %s1108_s15, %s1544_s20 }
  0x1e   : > { %s173_s27 = sor.u32 %s172_s22, %s171_s26  ;;  %p1254_p12 = por %p221_p10, %p189_p5 }
  0x1f   : > { %s1512_s25 = scalar_select %p1246_p9, 1, 0 }
  0x20   : > { %p174_p11 = scmp.eq.s32.totalorder %s173_s27, 0  ;;  %p846_p13 = scmp.lt.s32.totalorder %s1112_s16, 4 }
  0x21   : > { %1513 = sst [smem:[#allocation15_spill]] %s1512_s25  ;;  %s315_s29 = sand.u32 1, %s1092_s11  }
  0x22   : > { %s1514_s28 = scalar_select %p1254_p12, 1, 0 }
  0x23   : > { %s1261_s19 = scalar_select %p174_p11, %s1092_s11, %s176_s21  }
  0x24   : > { %s772_s30 = sshll.u32 %s315_s29, 4  ;;  %s773_s9 = sshll.u32 %s1108_s15, 2 }
  0x25   : > { %s324_s7 = sadd.s32 %s1104_s14, %s773_s9  ;;  %s319_s8 = scalar_lea.vmem [#allocation2], %s772_s30 }
  0x26   : > { %s327_s2 = sshll.u32 %s319_s8, 4  ;;  %s774_s25 = sshll.u32 %s324_s7, 7  ;;  %s1265_s2 = int_to_ptr.vmem [resolvable:$true] %s327_s2 }
  0x27   : > { %s1270_s22 = scalar_lea.hbm %s1485_s6, %s774_s25  ;;  %p1274_p0 = pnand %p846_p13, %p1232_p3 }
  0x28   : > { %s1278_s8 = scalar_lea.sflag [#allocation3], %s315_s29  ;;  %s924_s7 = scalar_lea.hbm %s1270_s22, 256 }
  0x29   : > { %p925_p1 = scmp.ne.s32.totalorder %s1270_s22, %s924_s7  ;;  %p926_p2 = pneg %p1274_p0 }
  0x2a   : > { %s929_s18 = scalar_lea.hbm %s1485_s6, 1024  ;;  %p930_p3 = scmp.lt.u32.totalorder %s1270_s22, %s1485_s6 }
  0x2b   : > { %p927_p4 = pnand %p926_p2, %p925_p1  ;;  %p931_p6 = scmp.lt.u32.totalorder %s929_s18, %s924_s7 }
  0x2c   : > { %p933_p10 = scmp.lt.u32.totalorder %s924_s7, %s1270_s22 }
  0x2d   : > { %p928_p5 = pneg %p927_p4  ;;  %p932_p7 = por %p931_p6, %p930_p3 }
  0x2f   : > { %p934_p11 = por %p933_p10, %p932_p7 }
  0x31   : > { %p935_p13 = pnand %p934_p11, %p928_p5 }
  0x33   : > { %938 = shalt.err (!%p935_p13)
}
  0x34   : > { %s939_s25 = scalar_lea.vmem %s1265_s2, 256  ;;  %s1114_s26 = smov [#allocation2]  }
  0x35   : > { %p940_p1 = scmp.ne.s32.totalorder %s1265_s2, %s939_s25  ;;  %s944_s27 = sshll.u32 %s1114_s26, 4  ;;  %s945_s27 = int_to_ptr.vmem [resolvable:$false] %s944_s27 }
  0x36   : > { %s946_s29 = scalar_lea.vmem %s945_s27, 512  ;;  %p947_p9 = scmp.lt.s32.totalorder %s1265_s2, %s945_s27 }
  0x37   : > { %p942_p4 = pnand %p940_p1, %p926_p2  ;;  %p948_p3 = scmp.lt.s32.totalorder %s946_s29, %s939_s25 }
  0x39   : > { %p943_p12 = pneg %p942_p4  ;;  %p949_p6 = por %p948_p3, %p947_p9 }
  0x3b   : > { %p950_p7 = pnand %p949_p6, %p943_p12 }
  0x3d   : > { %953 = shalt.err (!%p950_p7)
}
  0x3e   : > { %s1115_s7 = smov 256   ;;  %s1116_s9 = smov 128  }
  0x3f   : > { %s1117_s30 = smov 8   ;;  %p775_p2 = scmp.ge.s32.totalorder %s1112_s16, 1 }
  0x40   : > { %835 = dma.hbm_to_vmem [thread:$0]  (!%p1274_p0), %s1270_s22, 256, %s1265_s2, %s1278_s8, %s1115_s7, %s1116_s9, %s1117_s30  }
  0x41   : > { %p335_p5 = scmp.lt.s32.totalorder %s1112_s16, 5 }
  0x43   : > { %p336_p10 = pnand %p775_p2, %p335_p5 }
  0x44   : > { %s1309_s18 = sand.u32 (!%p336_p10), 1, %s1088_s10  }
  0x45   : > { %339 = sbr.rel (%p336_p10) target bundleno = 367 (0x16f), region = 48  ;;  %s776_s20 = sshll.u32 (!%p336_p10), %s1309_s18, 4 }
  0x46   : > { %s342_s23 = scalar_lea.sflag (!%p336_p10), [#allocation3], %s1309_s18  ;;  %s345_s25 = scalar_lea.vmem (!%p336_p10), [#allocation2], %s776_s20 }
  0x4c   : > { %1071 = dma.done.wait (%p1242_p8), %s342_s23, 256  }
  0x4d   : > { %1073 = vsyncadd (%p1242_p8), %s342_s23, 4294967040  ;;  %v1118_v0 = vmov 0.0   ;;  %vm1119_vm0 = vmmov 0   ;;  %v1120_v1 = vmov 0   ;;  %v389_v2 = vld [vmem:[%s345_s25] sm:$0xff]  ;;  %v390_v3 = vld [vmem:[%s345_s25 + $0x8] sm:$0xff] }
  0x4e   : > { %806 = vmatprep.subr.bf16.mxu0 %v1118_v0  ;;  %808 = vmatprep.mubr.msk.bf16.mxu0 %vm1119_vm0, %v1118_v0  ;;  %v391_v4 = vpack.c.bf16 %v390_v3, %v389_v2  ;;  %s1516_s4 = sld [smem:[#allocation20_spill]]  ;;  %s1517_s0 = sld [smem:[#allocation16_spill]]  ;;  %vm399_vm1 = vcmask 130048   ;;  %v495_v8 = vld [vmem:[%s1484_s5] sm:$0xff]  ;;  %v496_v10 = vld [vmem:[%s1484_s5 + $0x8] sm:$0xff] }
  0x4f   : > { %812 = vmatprep.subr.bf16.mxu1 %v1118_v0  ;;  %814 = vmatprep.mubr.msk.bf16.mxu1 %vm1119_vm0, %v1118_v0  ;;  %s1518_s1 = sld [smem:[#allocation17_spill]]  ;;  %s1519_s3 = sld [smem:[#allocation19_spill]] }
  0x50   : > { %921 = vset.pattern.permute.xlu0 %v1120_v1  ;;  %922 = vset.pattern.permute.xlu1 %v1120_v1  ;;  %s1520_s2 = sld [smem:[#allocation18_spill]]  ;;  %s785_s22 = sshll.u32 %s1100_s13, 1 }
  0x51   : > { %807 = vmatpush3.bf16.msra.mxu0 %v391_v4  ;;  %813 = vmatpush3.bf16.msra.mxu1 %v391_v4  ;;  %s590_s24 = sadd.s32 %s1096_s12, %s785_s22  ;;  %s574_s21 = sand.u32 1, %s1218_s17  }
  0x52   : > { %818 = vmatprep.subr.bf16.mxu0 %v1118_v0  ;;  %499 = vperm.xlu1 %922, %v495_v8   ;;  %s786_s8 = sshll.u32 %s590_s24, 4  ;;  %s380_s27 = scalar_lea.vmem [#allocation6], %s1309_s18 }
  0x53   : > { %s609_s29 = sshll.u32 %s380_s27, 4  ;;  %s374_s7 = scalar_lea.vmem [#allocation5], %s1309_s18  ;;  %s1356_s29 = int_to_ptr.vmem [resolvable:$true] %s609_s29 }
  0x54   : > { %v444_v5 = vld [vmem:[%s1516_s4] sm:$0x3]  ;;  %s594_s9 = sshll.u32 %s374_s7, 4  ;;  %s789_s30 = sshll.u32 %s1100_s13, 2  ;;  %s1365_s9 = int_to_ptr.vmem [resolvable:$true] %s594_s9 }
  0x55   : > { %v392_v6 = vld [vmem:[%s1517_s0] sm:$0x1]  ;;  %447 = vperm.xlu0 %921, %v444_v5   ;;  %s1521_s25 = sld [smem:[#allocation22_spill]]  ;;  %s1522_s17 = sld [smem:[#allocation15_spill]] }
  0x56   : > { %v443_v7 = vld [vmem:[%s1518_s1] sm:$0x1]  ;;  %809 = vmatmul.mubr.msk.bf16.vlgmr.msra.gmra.mrb[0].mxu0 %vm399_vm1, %v392_v6  ;;  %504 = vperm.xlu1 %922, %v496_v10   ;;  %s1523_s24 = sld [smem:[#allocation21_spill]]  ;;  %s1368_s20 = sadd.s32 %s1096_s12, %s789_s30 }
  0x57   : > { %v393_v9 = vld [vmem:[%s1519_s3] sm:$0x3]  ;;  %815 = vmatmul.mubr.msk.bf16.vlgmr.msra.gmra.mrb[0].mxu1 %vm399_vm1, %v443_v7  ;;  %819 = vmatpush3.bf16.msra.mxu0 %v391_v4  ;;  %s1370_s23 = scalar_lea.sflag [#allocation7], %s574_s21  ;;  %s954_s0 = scalar_lea.vmem %s1356_s29, 16 }
  0x58   : > { %820 = vmatprep.mubr.msk.bf16.mxu0 %vm1119_vm0, %v1118_v0  ;;  %v923_v11 = vld [vmem:[%s1520_s2] sm:$0xff]   ;;  %p955_p8 = scmp.ne.s32.totalorder %s1356_s29, %s954_s0  ;;  %s1121_s1 = smov [#allocation6]  }
  0x59   : > { %396 = vperm.xlu0 %921, %v393_v9   ;;  %s958_s3 = sshll.u32 %s1121_s1, 4  ;;  %s959_s3 = int_to_ptr.vmem [resolvable:$false] %s958_s3 }
  0x5a   : > { %s960_s4 = scalar_lea.vmem %s959_s3, 32  ;;  %p961_p11 = scmp.lt.s32.totalorder %s1356_s29, %s959_s3 }
  0x5b   : > { %s1354_s2 = scalar_lea.hbm %s1521_s25, %s786_s8  ;;  %p1524_p9 = scmp.ne.s32.totalorder %s1522_s17, 0 }
  0x5c   : > { %s1363_s26 = scalar_lea.hbm %s1523_s24, %s786_s8  ;;  %p962_p13 = scmp.lt.s32.totalorder %s960_s4, %s954_s0 }
  0x5d   : > { %p956_p12 = pnand %p955_p8, %p1524_p9 }
  0x5e   : > { %821 = vmatmul.mubr.msk.bf16.vlgmr.msra.gmra.mrb[4].mxu0 %vm399_vm1, %v923_v11  ;;  %p963_p1 = por %p962_p13, %p961_p11 }
  0x5f   : > { %p957_p0 = pneg %p956_p12 }
  0x61   : > { %p964_p4 = pnand %p963_p1, %p957_p0 }
  0xd1   : > { %v1358_v26 = vpop.permute.xlu1 %499 }
  0xd4   : > { %v448_v12 = vpop.permute.xlu0 %447 }
  0xd8   : > { %v397_v13 = vpop.permute.xlu0 %396 }
 0x129   : > { %v437_v14 = vpop.f32.mrb[0].mxu0 }
 0x12a   : > { %v487_v15 = vpop.f32.mrb[0].mxu1  ;;  %v438_v16 = vadd.f32 %v437_v14, %v397_v13  ;;  %v810_v17 = vpop.f32.mrb[1].mxu0 }
 0x12b   : > { %v488_v18 = vadd.f32 %v487_v15, %v448_v12  ;;  %v816_v19 = vpop.f32.mrb[1].mxu1  ;;  %v440_v20 = vpop.f32.mrb[2].mxu0 }
 0x12c   : > { %v490_v21 = vpop.f32.mrb[2].mxu1  ;;  %v556_v22 = vpack.c.bf16 %v438_v16, %v438_v16  ;;  %v811_v23 = vpop.f32.mrb[3].mxu0 }
 0x12d   : > { %v558_v24 = vpack.c.bf16 %v488_v18, %v488_v18  ;;  %v817_v25 = vpop.f32.mrb[3].mxu1 }
 0x12e   : > { %557 = vst [vmem:[%s374_s7] sm:$0x1] %v556_v22 }
 0x12f   : > { %559 = vst [vmem:[%s380_s27] sm:$0x1] %v558_v24 }
 0x130   : > { %967 = shalt.err (!%p964_p4)
}
 0x131   : > { %s968_s12 = scalar_lea.hbm %s1354_s2, 16  ;;  %s972_s1 = scalar_lea.hbm %s1521_s25, 64 }
 0x132   : > { %p969_p3 = scmp.ne.s32.totalorder %s1354_s2, %s968_s12  ;;  %p973_p2 = scmp.lt.u32.totalorder %s1354_s2, %s1521_s25 }
 0x133   : > { %p974_p5 = scmp.lt.u32.totalorder %s972_s1, %s968_s12  ;;  %p976_p8 = scmp.lt.u32.totalorder %s968_s12, %s1354_s2 }
 0x134   : > { %p970_p6 = pnand %p969_p3, %p1524_p9 }
 0x135   : > { %p975_p10 = por %p974_p5, %p973_p2 }
 0x136   : > { %p971_p7 = pneg %p970_p6 }
 0x137   : > { %p977_p12 = por %p976_p8, %p975_p10 }
 0x139   : > { %p978_p0 = pnand %p977_p12, %p971_p7 }
 0x13b   : > { %981 = shalt.err (!%p978_p0)
}
 0x13c   : > { %827 = dma.vmem_to_hbm [thread:$0]  (%p1524_p9), %s1356_s29, 16, %s1354_s2, %s1370_s23  }
 0x13d   : > { %s571_s0 = scalar_lea.sflag [#allocation4], %s1309_s18  ;;  %s982_s4 = scalar_lea.vmem %s1365_s9, 16 }
 0x13e   : > { %p983_p11 = scmp.ne.s32.totalorder %s1365_s9, %s982_s4  ;;  %s1122_s7 = smov [#allocation5]  }
 0x13f   : > { %s986_s30 = sshll.u32 %s1122_s7, 4  ;;  %s987_s30 = int_to_ptr.vmem [resolvable:$false] %s986_s30 }
 0x140   : > { %p984_p13 = pnand %p983_p11, %p1524_p9  ;;  %s988_s13 = scalar_lea.vmem %s987_s30, 32 }
 0x141   : > { %p989_p4 = scmp.lt.s32.totalorder %s1365_s9, %s987_s30  ;;  %p990_p3 = scmp.lt.s32.totalorder %s988_s13, %s982_s4 }
 0x142   : > { %p985_p1 = pneg %p984_p13 }
 0x143   : > { %p991_p6 = por %p990_p3, %p989_p4 }
 0x145   : > { %p992_p7 = pnand %p991_p6, %p985_p1 }
 0x147   : > { %995 = shalt.err (!%p992_p7)
}
 0x148   : > { %s996_s29 = scalar_lea.hbm %s1363_s26, 16  ;;  %s1000_s12 = scalar_lea.hbm %s1523_s24, 64 }
 0x149   : > { %p997_p2 = scmp.ne.s32.totalorder %s1363_s26, %s996_s29  ;;  %p1001_p8 = scmp.lt.u32.totalorder %s1363_s26, %s1523_s24 }
 0x14a   : > { %p1002_p12 = scmp.lt.u32.totalorder %s1000_s12, %s996_s29  ;;  %p1004_p11 = scmp.lt.u32.totalorder %s996_s29, %s1363_s26 }
 0x14b   : > { %p998_p5 = pnand %p997_p2, %p1524_p9 }
 0x14c   : > { %p1003_p0 = por %p1002_p12, %p1001_p8 }
 0x14d   : > { %p999_p10 = pneg %p998_p5 }
 0x14e   : > { %p1005_p13 = por %p1004_p11, %p1003_p0 }
 0x150   : > { %p1006_p1 = pnand %p1005_p13, %p999_p10 }
 0x152   : > { %1009 = shalt.err (!%p1006_p1)
}
 0x153   : > { %826 = dma.vmem_to_hbm [thread:$0]  (%p1524_p9), %s1365_s9, 16, %s1363_s26, %s571_s0   ;;  %v549_v27 = vpop.f32.mrb[4].mxu0  ;;  %v505_v29 = vpop.permute.xlu1 %504 }
 0x154   : > { %s1525_s1 = sshll.u32 %s1309_s18, 3  ;;  %v822_v28 = vpop.f32.mrb[5].mxu0  ;;  %s790_s4 = sshll.u32 %s1368_s20, 6  ;;  %v550_v31 = vadd.f32 %v549_v27, %v1358_v26 }
 0x155   : > { %s387_s27 = scalar_lea.vmem [#allocation8], %s1525_s1  ;;  %v552_v30 = vpop.f32.mrb[6].mxu0  ;;  %s1526_s9 = sld [smem:[#allocation23_spill]] }
 0x156   : > { %s623_s3 = sshll.u32 %s387_s27, 4  ;;  %v553_v32 = vadd.f32 %v552_v30, %v505_v29  ;;  %v823_v33 = vpop.f32.mrb[7].mxu0  ;;  %s1123_s20 = smov [#allocation8]   ;;  %s1420_s3 = int_to_ptr.vmem [resolvable:$true] %s623_s3 }
 0x157   : > { %s1010_s0 = scalar_lea.vmem %s1420_s3, 128  ;;  %s1014_s30 = sshll.u32 %s1123_s20, 4  ;;  %s1015_s30 = int_to_ptr.vmem [resolvable:$false] %s1014_s30 }
 0x158   : > { %v798_v34 = vpack.c.bf16 %v553_v32, %v550_v31  ;;  %p1011_p4 = scmp.ne.s32.totalorder %s1420_s3, %s1010_s0  ;;  %s1016_s13 = scalar_lea.vmem %s1015_s30, 256 }
 0x159   : > { %p1017_p7 = scmp.lt.s32.totalorder %s1420_s3, %s1015_s30  ;;  %p1018_p2 = scmp.lt.s32.totalorder %s1016_s13, %s1010_s0 }
 0x15a   : > { %799 = vst [vmem:[%s387_s27] sm:$0xff] %v798_v34   ;;  %p1012_p3 = pnand %p1011_p4, %p1524_p9 }
 0x15b   : > { %s1425_s18 = scalar_lea.hbm %s1526_s9, %s790_s4  ;;  %p1019_p5 = por %p1018_p2, %p1017_p7 }
 0x15c   : > { %p1013_p6 = pneg %p1012_p3 }
 0x15e   : > { %p1020_p10 = pnand %p1019_p5, %p1013_p6 }
 0x160   : > { %1023 = shalt.err (!%p1020_p10)
}
 0x161   : > { %s1024_s29 = scalar_lea.hbm %s1425_s18, 128  ;;  %s1028_s12 = scalar_lea.hbm %s1526_s9, 512 }
 0x162   : > { %p1025_p8 = scmp.ne.s32.totalorder %s1425_s18, %s1024_s29  ;;  %p1029_p11 = scmp.lt.u32.totalorder %s1425_s18, %s1526_s9 }
 0x163   : > { %p1030_p13 = scmp.lt.u32.totalorder %s1028_s12, %s1024_s29  ;;  %p1032_p4 = scmp.lt.u32.totalorder %s1024_s29, %s1425_s18 }
 0x164   : > { %p1026_p12 = pnand %p1025_p8, %p1524_p9 }
 0x165   : > { %p1031_p1 = por %p1030_p13, %p1029_p11 }
 0x166   : > { %p1027_p0 = pneg %p1026_p12 }
 0x167   : > { %p1033_p3 = por %p1032_p4, %p1031_p1 }
 0x169   : > { %p1034_p6 = pnand %p1033_p3, %p1027_p0 }
 0x16b   : > { %1037 = shalt.err (!%p1034_p6)
}
 0x16c   : > { %s1124_s1 = smov 64   ;;  %s1125_s27 = smov 128  }
 0x16d   : > { %s1126_s4 = smov 4  }
 0x16e   : > { %828 = dma.vmem_to_hbm [thread:$0]  (%p1524_p9), %s1420_s3, 128, %s1425_s18, %s1370_s23, %s1124_s1, %s1125_s27, %s1126_s4  }
 0x16f PF: > { %s1527_s7 = sld [smem:[#allocation12_spill]]  ;;  %p847_p7 = scmp.ge.s32.totalorder %s1112_s16, 2 }
 0x170   : > { %p1528_p2 = scmp.ne.s32.totalorder %s1514_s28, 0 }
 0x172   : > { %p837_p5 = pnand %p847_p7, %p1528_p2 }
 0x175   : > { %s638_s26 = sand.u32 1, %s1527_s7  }
 0x176   : > { %s639_s0 = scalar_lea.sflag [#allocation4], %s638_s26 }
 0x177   : > { %1075 = dma.done.wait (!%p837_p5), %s639_s0, 16  }
 0x178   : > { %1077 = vsyncadd (!%p837_p5), %s639_s0, 4294967280  ;;  %s1529_s20 = sadd.s32 4294967294, %s1112_s16  }
 0x179   : > { %s646_s30 = sand.u32 1, %s1529_s20  }
 0x17a   : > { %s647_s13 = scalar_lea.sflag [#allocation7], %s646_s30 }
 0x17b   : > { %1079 = dma.done.wait (!%p837_p5), %s647_s13, 144  }
 0x17c   : > { %1081 = vsyncadd (!%p837_p5), %s647_s13, 4294967152  ;;  %s29_s16 = sadd.s32 1, %s1112_s16   ;;  %s1530_s17 = sld [smem:[#allocation13_spill]] }
 0x17d   : > { %p26_p9 = scmp.ge.s32.totalorder %s29_s16, 6   ;;  %s1531_s28 = sld [smem:[#allocation14_spill]] }
 0x17e   : > { %s1532_s30 = smov %s1088_s10  ;;  %s1533_s10 = smov %s1092_s11 }
 0x17f   : > { %s1534_s11 = smov %s1261_s19  ;;  %s1535_s12 = smov %s1104_s14 }
 0x180   : > { %s1536_s13 = smov %s1108_s15  ;;  %28 = sbr.rel (!%p26_p9) target bundleno = 18 (0x12), region = 125 }
 0x182   : > { %s1537_s14 = smov %s1530_s17 }
 0x183   : > { %s1538_s15 = smov %s1531_s28 }
 0x187   :  { %660 = vsyncpa [#allocation3], 1 }
 0x188   :  { %662 = vsyncpa [#allocation3 + $0x1], 1 }
 0x189   :  { %663 = vsyncpa [#allocation4], 1 }
 0x18a   :  { %665 = vsyncpa [#allocation4 + $0x1], 1 }
 0x18b   :  { %666 = vsyncpa [#allocation7], 1 }
 0x18c   :  { %668 = vsyncpa [#allocation7 + $0x1], 1 }

</bundles_post_ra>
